<compile_context>
chip_gen: v7x
topology: tpu7x:2x2x1
jax: 0.10.0
libtpu: 0.0.40
codegen_flags: <defaults>
</compile_context>

<pallas_src>
import jax
import jax.numpy as jnp
from jax.experimental import pallas as pl
from jax.experimental.pallas import tpu as pltpu

LEAKY_RATE = 0.1


def _round_up(x, m):
    return ((x + m - 1) // m) * m


def _conv1d_k1_kernel(x_ref, w_ref, b_ref, o_ref):
    # x_ref: (tm, C_in); w_ref: (C_in, C_out); b_ref: (1, C_out); o_ref: (tm, C_out)
    acc = jnp.dot(x_ref[...], w_ref[...], preferred_element_type=jnp.float32)
    acc = acc + b_ref[...]                      # broadcast bias over rows (f32)
    acc = jnp.maximum(acc, LEAKY_RATE * acc)    # LeakyReLU(0.1), 0 < slope < 1
    o_ref[...] = acc.astype(o_ref.dtype)


def conv1d_k1_leaky(x, weight, bias, *, tm=2048):
    """x: (B, N, C_in); weight: (C_out, C_in) [nn.Conv1d weight with k=1 squeezed];
    bias: (C_out,). Returns (B, N, C_out) in x.dtype."""
    B, N, C_in = x.shape
    C_out = weight.shape[0]
    M = B * N

    # Large row tile to amortize per-step pipeline overhead; sublane-aligned,
    # clamped for tiny M. cdiv grid => no M padding, partial last tile is masked.
    tm_eff = min(tm, _round_up(M, 8))
    grid = (pl.cdiv(M, tm_eff),)

    x2d = x.reshape(M, C_in)          # free reshape — no copy, no cast, no pad
    w_t = weight.T                    # (C_in, C_out); tiny one-time transpose
    b2d = bias.reshape(1, C_out)

    out2d = pl.pallas_call(
        _conv1d_k1_kernel,
        out_shape=jax.ShapeDtypeStruct((M, C_out), x.dtype),
        grid_spec=pltpu.PrefetchScalarGridSpec(
            num_scalar_prefetch=0,
            grid=grid,
            in_specs=[
                pl.BlockSpec((tm_eff, C_in), lambda i: (i, 0)),     # streamed rows
                pl.BlockSpec((C_in, C_out), lambda i: (0, 0)),      # weight resident
                pl.BlockSpec((1, C_out), lambda i: (0, 0)),         # bias resident
            ],
            out_specs=pl.BlockSpec((tm_eff, C_out), lambda i: (i, 0)),
        ),
        compiler_params=pltpu.CompilerParams(
            dimension_semantics=("parallel",),   # shard row tiles across TCs (v7x)
        ),
    )(x2d, w_t, b2d)

    return out2d.reshape(B, N, C_out)


def _reference(x, weight, bias):
    # Pure f32 reference matching PyTorch Conv1d(k=1) + bias + LeakyReLU(0.1).
    y = jnp.einsum("bnc,oc->bno", x, weight) + bias[None, None, :]
    return jnp.maximum(y, LEAKY_RATE * y).astype(x.dtype)


if __name__ == "__main__":
    # Module config (synthetic, deterministic init)
    in_channels, out_channels = 32, 64
    B, N = 2, 16

    key = jax.random.PRNGKey(0)
    kx, kw, kb = jax.random.split(key, 3)

    x = jax.random.normal(kx, (B, N, in_channels), dtype=jnp.float32)
    # nn.Conv1d weight shape is (out_channels, in_channels, kernel_size=1) -> squeeze k
    weight = jax.random.normal(kw, (out_channels, in_channels), dtype=jnp.float32) * 0.1
    bias = jax.random.normal(kb, (out_channels,), dtype=jnp.float32) * 0.1

    out = conv1d_k1_leaky(x, weight, bias)
    out = jax.block_until_ready(out)

    ref = _reference(x, weight, bias)
    assert out.shape == (B, N, out_channels)
    assert jnp.allclose(out, ref, atol=1e-3, rtol=1e-3), float(jnp.max(jnp.abs(out - ref)))

    print("KERNEL_OK")
</pallas_src>

<mosaic_0001>
module attributes {stable_mosaic.version = 11 : i64} {
  func.func @_conv1d_k1_kernel(%arg0: i32, %arg1: memref<32x32xf32, #tpu.memory_space<vmem>>, %arg2: memref<32x64xf32, #tpu.memory_space<vmem>>, %arg3: memref<1x64xf32, #tpu.memory_space<vmem>>, %arg4: memref<32x64xf32, #tpu.memory_space<vmem>>) attributes {dimension_semantics = [#tpu.dimension_semantics<parallel>], iteration_bounds = array<i64: 1>, scalar_prefetch = 0 : i64, scratch_operands = 0 : i64, tpu.core_type = #tpu.core_type<tc>, window_params = [{transform_indices = @transform_0, window_bounds = array<i64: 32, 32>}, {pipeline_mode = #tpu.pipeline_mode<synchronous>, transform_indices = @transform_1, window_bounds = array<i64: 32, 64>}, {pipeline_mode = #tpu.pipeline_mode<synchronous>, transform_indices = @transform_2, window_bounds = array<i64: 1, 64>}, {transform_indices = @transform_3, window_bounds = array<i64: 32, 64>}]} {
    %c0 = arith.constant 0 : index
    %c0_0 = arith.constant 0 : index
    %0 = vector.load %arg1[%c0, %c0_0] : memref<32x32xf32, #tpu.memory_space<vmem>>, vector<32x32xf32>
    %c0_1 = arith.constant 0 : index
    %c0_2 = arith.constant 0 : index
    %1 = vector.load %arg2[%c0_1, %c0_2] : memref<32x64xf32, #tpu.memory_space<vmem>>, vector<32x64xf32>
    %cst = arith.constant dense<0.000000e+00> : vector<32x64xf32>
    %2 = tpu.matmul %0, %1, %cst {dimension_numbers = #tpu.dot_dimension_numbers<[1], [0], [0], [1], [0, 0, 1, 1], [], []>} : vector<32x32xf32>, vector<32x64xf32>, vector<32x64xf32> -> vector<32x64xf32>
    %c0_3 = arith.constant 0 : index
    %c0_4 = arith.constant 0 : index
    %3 = vector.load %arg3[%c0_3, %c0_4] : memref<1x64xf32, #tpu.memory_space<vmem>>, vector<1x64xf32>
    %4 = vector.broadcast %3 : vector<1x64xf32> to vector<32x64xf32>
    %5 = arith.addf %2, %4 : vector<32x64xf32>
    %cst_5 = arith.constant 1.000000e-01 : f32
    %6 = vector.broadcast %cst_5 : f32 to vector<32x64xf32>
    %7 = arith.mulf %6, %5 : vector<32x64xf32>
    %8 = arith.maximumf %5, %7 : vector<32x64xf32>
    %c0_6 = arith.constant 0 : index
    %c0_7 = arith.constant 0 : index
    %9 = vector.load %arg4[%c0_6, %c0_7] : memref<32x64xf32, #tpu.memory_space<vmem>>, vector<32x64xf32>
    tpu.vector_store %arg4[%c0_6, %c0_7], %8 {strides = array<i32>} : memref<32x64xf32, #tpu.memory_space<vmem>>, vector<32x64xf32>,
    return
  }
  func.func @transform_0(%arg0: i32) -> (i32, i32) {
    %c0_i32 = arith.constant 0 : i32
    %c0_i32_0 = arith.constant 0 : i32
    return %arg0, %c0_i32 : i32, i32
  }
  func.func @transform_1(%arg0: i32) -> (i32, i32) {
    %c0_i32 = arith.constant 0 : i32
    %c0_i32_0 = arith.constant 0 : i32
    %c0_i32_1 = arith.constant 0 : i32
    return %c0_i32, %c0_i32_0 : i32, i32
  }
  func.func @transform_2(%arg0: i32) -> (i32, i32) {
    %c0_i32 = arith.constant 0 : i32
    %c0_i32_0 = arith.constant 0 : i32
    %c0_i32_1 = arith.constant 0 : i32
    return %c0_i32, %c0_i32_0 : i32, i32
  }
  func.func @transform_3(%arg0: i32) -> (i32, i32) {
    %c0_i32 = arith.constant 0 : i32
    %c0_i32_0 = arith.constant 0 : i32
    return %arg0, %c0_i32 : i32, i32
  }
}

</mosaic_0001>

<bundles_post_ra>
// kernel: tpu_custom_call.1
= control target key start
LH: loop header
LB: loop body
LE: loop exit
PB: predicated region body
PF: predicated region fallthrough
CT: control target
= control target key end

     0   :  { %8 = vsyncpa [#allocation3], 0  ;;  %s380_s0 = inlined_call_operand.hbm [shape: f32[32,32], index: 0, kind: input, shape index: {}]   ;;  %s381_s1 = inlined_call_operand.hbm [shape: f32[32,64], index: 1, kind: input, shape index: {}]   ;;  %s382_s2 = inlined_call_operand.vmem [shape: f32[1,64], index: 2, kind: input, shape index: {}]   ;;  %s383_s3 = inlined_call_operand.hbm [shape: f32[32,64], index: 3, kind: output, shape index: {}]  }
   0x1   :  { %9 = vsyncpa [#allocation6], 0 }
   0x2   :  { %10 = vsyncpa [#allocation4], 0  ;;  %s303_s12 = smov [#allocation2]   ;;  %s231_s16 = scalar_lea.hbm %s380_s0, 512 }
   0x3   :  { %s16_s13 = sshll.u32 %s303_s12, 4  ;;  %p232_p0 = scmp.ne.s32.totalorder %s380_s0, %s231_s16  ;;  %s17_s13 = int_to_ptr.vmem [resolvable:$true] %s16_s13 }
   0x4   :  { %p235_p1 = scmp.lt.u32.totalorder %s231_s16, %s380_s0 }
   0x6   :  { %p237_p2 = pnand %p235_p1, %p232_p0 }
   0x8   :  { %240 = shalt.err (!%p237_p2)
}
   0x9   :  { %s241_s21 = scalar_lea.vmem %s17_s13, 512  ;;  %p246_p4 = scmp.lt.s32.totalorder %s17_s13, %s17_s13 }
   0xa   :  { %p242_p3 = scmp.ne.s32.totalorder %s17_s13, %s241_s21  ;;  %p247_p5 = scmp.lt.s32.totalorder %s241_s21, %s241_s21 }
   0xc   :  { %p248_p6 = por %p247_p5, %p246_p4 }
   0xe   :  { %p249_p7 = pnand %p248_p6, %p242_p3 }
  0x10   :  { %252 = shalt.err (!%p249_p7)
}
  0x11   :  { %s304_s22 = smov 128   ;;  %s305_s23 = smov 8  }
  0x12   :  { %22 = dma.hbm_to_vmem [thread:$0]  %s380_s0, 512, %s17_s13, [#allocation3], %s304_s22, %s304_s22, %s305_s23  }
  0x13   :  { %s306_s26 = smov [#allocation5]   ;;  %s253_s30 = scalar_lea.hbm %s381_s1, 512 }
  0x14   :  { %s28_s27 = sshll.u32 %s306_s26, 4  ;;  %p254_p8 = scmp.ne.s32.totalorder %s381_s1, %s253_s30  ;;  %s29_s27 = int_to_ptr.vmem [resolvable:$true] %s28_s27 }
  0x15   :  { %p257_p9 = scmp.lt.u32.totalorder %s253_s30, %s381_s1 }
  0x17   :  { %p259_p10 = pnand %p257_p9, %p254_p8 }
  0x19   :  { %262 = shalt.err (!%p259_p10)
}
  0x1a   :  { %s263_s8 = scalar_lea.vmem %s29_s27, 512  ;;  %p268_p12 = scmp.lt.s32.totalorder %s29_s27, %s29_s27 }
  0x1b   :  { %p264_p11 = scmp.ne.s32.totalorder %s29_s27, %s263_s8  ;;  %p269_p13 = scmp.lt.s32.totalorder %s263_s8, %s263_s8 }
  0x1d   :  { %p270_p0 = por %p269_p13, %p268_p12 }
  0x1f   :  { %p271_p1 = pnand %p270_p0, %p264_p11 }
  0x21   :  { %274 = shalt.err (!%p271_p1)
}
  0x22   :  { %34 = dma.hbm_to_vmem [thread:$0]  %s381_s1, 512, %s29_s27, [#allocation6], %s304_s22, %s304_s22, %s305_s23  }
  0x23   :  { %297 = dma.done.wait [#allocation3], 512  }
  0x24   :  { %298 = vsyncadd [#allocation3], 4294966784 }
  0x25   :  { %299 = dma.done.wait [#allocation6], 512  }
  0x26   :  { %300 = vsyncadd [#allocation6], 4294966784  ;;  %vm58_vm0 = vcmask 261120   ;;  %v47_v0 = vld [vmem:[#allocation5] sm:$0xff]  ;;  %v48_v1 = vld [vmem:[#allocation5 + $0x8] sm:$0xff]  ;;  %s307_s11 = smov [#allocation7]  }
  0x27   :  { %v49_v2 = vld [vmem:[#allocation5 + $0x10] sm:$0xff]  ;;  %v214_v3 = vpack.c.bf16 %v48_v1, %v47_v0  ;;  %v50_v4 = vld [vmem:[#allocation5 + $0x18] sm:$0xff]  ;;  %v43_v5 = vld [vmem:[#allocation2] sm:$0xff]  ;;  %s174_s12 = sshll.u32 %s307_s11, 4  ;;  %vm164_vm1 = vcmask 523264   ;;  %s175_s12 = int_to_ptr.vmem [resolvable:$true] %s174_s12 }
  0x28   :  { %v45_v6 = vld [vmem:[#allocation2 + $0x10] sm:$0xff]  ;;  %v218_v7 = vpack.c.bf16 %v50_v4, %v49_v2  ;;  %208 = vmatprep.mubr.msk.f32.mxu0 %vm58_vm0, %v43_v5  ;;  %v44_v8 = vld [vmem:[#allocation2 + $0x8] sm:$0xff]  ;;  %v46_v9 = vld [vmem:[#allocation2 + $0x18] sm:$0xff]  ;;  %p280_p3 = scmp.lt.s32.totalorder %s175_s12, %s175_s12 }
  0x29   :  { %211 = vmatprep.mubr.msk.f32.mxu1 %vm58_vm0, %v45_v6  ;;  %215 = vmatprep.subr.bf16.mxu0 %v214_v3  ;;  %v187_v10 = vld [vmem:[%s382_s2] ss:$0 sm:$0xff]  ;;  %s275_s2 = scalar_lea.vmem %s175_s12, 512 }
  0x2a   :  { %222 = vmatprep.subr.bf16.mxu1 %v214_v3  ;;  %217 = vmatpush3.bf16.msra.mxu0 %v214_v3  ;;  %p276_p2 = scmp.ne.s32.totalorder %s175_s12, %s275_s2  ;;  %p281_p4 = scmp.lt.s32.totalorder %s275_s2, %s275_s2 }
  0x2b   :  { %224 = vmatpush3.bf16.msra.mxu1 %v214_v3  ;;  %219 = vmatprep.subr.bf16.mxu0 %v218_v7 }
  0x2c   :  { %223 = vmatprep.subr.bf16.mxu1 %v218_v7  ;;  %p282_p5 = por %p281_p4, %p280_p3 }
  0x2e   :  { %221 = vmatpush3.bf16.msra.mxu0 %v218_v7  ;;  %p283_p6 = pnand %p282_p5, %p276_p2 }
  0x2f   :  { %225 = vmatpush3.bf16.msra.mxu1 %v218_v7 }
  0x31   :  { %209 = vmatmul.mubr.msk.f32.vlgmr.msra.gmra.mrb[0].mxu0 %vm58_vm0, %v44_v8 }
  0x32   :  { %212 = vmatmul.mubr.msk.f32.vlgmr.msra.gmra.mrb[0].mxu1 %vm58_vm0, %v46_v9 }
 0x104   :  { %v210_v11 = vpop.f32.mrb[0].mxu0 }
 0x105   :  { %v213_v12 = vpop.f32.mrb[0].mxu1  ;;  %v143_v13 = vadd.f32 %v210_v11, %v187_v10  ;;  %v137_v15 = vpop.f32.mrb[1].mxu0 }
 0x106   :  { %v153_v14 = vadd.f32 %v213_v12, %v187_v10  ;;  %v147_v16 = vpop.f32.mrb[1].mxu1  ;;  %v138_v17 = vadd.f32 %v187_v10, %v137_v15 }
 0x107   :  { %v148_v18 = vadd.f32 %v187_v10, %v147_v16  ;;  %v157_v19 = vmul.f32 0.1, %v143_v13 }
 0x108   :  { %v159_v20 = vmul.f32 0.1, %v153_v14  ;;  %v156_v21 = vmul.f32 0.1, %v138_v17 }
 0x109   :  { %v158_v22 = vmul.f32 0.1, %v148_v18  ;;  %v161_v23 = vmax.f32 %v143_v13, %v157_v19 }
 0x10a   :  { %v163_v24 = vmax.f32 %v153_v14, %v159_v20  ;;  %v160_v25 = vmax.f32 %v138_v17, %v156_v21 }
 0x10b   :  { %v162_v26 = vmax.f32 %v148_v18, %v158_v22  ;;  %166 = vst.msk [vmem:[#allocation7 + $0x8] sm:$0xff] %vm164_vm1, %v161_v23 }
 0x10c   :  { %168 = vst.msk [vmem:[#allocation7 + $0x18] sm:$0xff] %vm164_vm1, %v163_v24  ;;  %165 = vst.msk [vmem:[#allocation7] sm:$0xff] %vm164_vm1, %v160_v25 }
 0x10d   :  { %167 = vst.msk [vmem:[#allocation7 + $0x10] sm:$0xff] %vm164_vm1, %v162_v26 }
 0x10e   :  { %286 = shalt.err (!%p283_p6)
}
 0x10f   :  { %s287_s15 = scalar_lea.hbm %s383_s3, 512 }
 0x110   :  { %p288_p7 = scmp.ne.s32.totalorder %s383_s3, %s287_s15  ;;  %p291_p8 = scmp.lt.u32.totalorder %s287_s15, %s383_s3 }
 0x112   :  { %p293_p9 = pnand %p291_p8, %p288_p7 }
 0x114   :  { %296 = shalt.err (!%p293_p9)
}
 0x115   :  { %180 = dma.vmem_to_hbm [thread:$0]  %s175_s12, 512, %s383_s3, [#allocation4], %s304_s22, %s304_s22, %s305_s23  }
 0x116   :  { %301 = dma.done.wait [#allocation4], 512  }
 0x117   :  { %302 = vsyncadd [#allocation4], 4294966784 }
 0x118   :  { %184 = vsyncpa [#allocation3], 1 }
 0x119   :  { %185 = vsyncpa [#allocation6], 1 }
 0x11a   :  { %186 = vsyncpa [#allocation4], 1 }

</bundles_post_ra>
